<compile_context>
chip_gen: v7x
topology: tpu7x:2x2x1
jax: 0.10.0
libtpu: 0.0.40
codegen_flags: <defaults>
</compile_context>

<pallas_src>
import jax
import jax.numpy as jnp
from jax.experimental import pallas as pl
from jax.experimental.pallas import tpu as pltpu

_LANE = 128
_SUBLANE = 8


def _round_up(x, m):
    return ((x + m - 1) // m) * m


# ----------------------------- Pallas kernel ------------------------------- #
def _classifier_kernel(patches_ref, w1_ref, pool_ref, w2_ref, b2_ref, out_ref):
    """Whole-batch classification hot path (single grid step).

    patches_ref : (NPp, Kp)  bf16  im2col patches for the whole batch (zero-padded)
    w1_ref      : (Kp, Fp)   bf16  conv-stem weight, im2col layout (zero-padded)
    pool_ref    : (N, NPp)   f32   block-diagonal 1/P global-average-pool matrix
    w2_ref      : (Fp, NCp)  f32   classifier weight (zero-padded)
    b2_ref      : (1, NCp)   f32   classifier bias (zero-padded)
    out_ref     : (N, NCp)   f32   padded logits (lane-dense store)
    """
    # Conv stem as one lane-aligned MXU matmul over the whole batch (bf16 in,
    # f32 accumulate).
    feat = jnp.dot(patches_ref[...], w1_ref[...],
                   preferred_element_type=jnp.float32)           # (NPp, Fp) f32
    # ReLU on the f32 accumulator (VPU; f32 keeps v5e happy).
    feat = jnp.maximum(feat, 0.0)
    # Global average pool per image via block-diagonal pooling matrix (MXU).
    pooled = jnp.dot(pool_ref[...], feat,
                     preferred_element_type=jnp.float32)         # (N, Fp) f32
    # Linear head, padded to a full 128-lane output -> unmasked vst.
    logits = jnp.dot(pooled, w2_ref[...],
                     preferred_element_type=jnp.float32) + b2_ref[...]
    out_ref[...] = logits.astype(out_ref.dtype)                  # (N, NCp)


# ------------------------------ host-side glue ----------------------------- #
def _im2col_3x3_same(x_nhwc):
    """3x3, stride 1, pad 1 im2col. Returns (N, H*W, 9*C)."""
    N, H, W, C = x_nhwc.shape
    xp = jnp.pad(x_nhwc, ((0, 0), (1, 1), (1, 1), (0, 0)))
    cols = []
    for i in range(3):
        for j in range(3):
            cols.append(xp[:, i:i + H, j:j + W, :])
    patches = jnp.concatenate(cols, axis=-1)                     # (N, H, W, 9C)
    return patches.reshape(N, H * W, 9 * C)


def custom_model_forward(x_nchw, params, *, stem_dtype=jnp.bfloat16):
    """Forward pass. x_nchw: (N, C, H, W) float32 -> (N, num_classes) float32."""
    w_conv = params["w_conv"]        # (3, 3, C_in, F)  (kh, kw, cin, f)
    w_fc = params["w_fc"]            # (F, NC)
    b_fc = params["b_fc"]            # (NC,)

    N, C, H, W = x_nchw.shape
    F = w_conv.shape[-1]
    NC = w_fc.shape[-1]
    P = H * W
    K = 9 * C
    NP = N * P

    # Lane/sublane-aligned (padded) sizes.
    Kp = _round_up(K, _LANE)
    Fp = _round_up(F, _LANE)
    NCp = _round_up(NC, _LANE)
    NPp = _round_up(NP, _SUBLANE)

    # --- glue: layout change, im2col, zero-padding (data movement only) ----- #
    # TODO(synk): for realistic image sizes, move im2col into the kernel (nine
    #             shifted accumulating matmuls over a DMA'd NHWC tile) to avoid
    #             materializing a 9x-expanded patches array in HBM.
    x_nhwc = jnp.transpose(x_nchw, (0, 2, 3, 1))                 # NCHW -> NHWC
    patches = _im2col_3x3_same(x_nhwc).reshape(NP, K)            # (NP, K)

    patches_p = jnp.zeros((NPp, Kp), stem_dtype).at[:NP, :K].set(
        patches.astype(stem_dtype))
    w1_p = jnp.zeros((Kp, Fp), stem_dtype).at[:K, :F].set(
        w_conv.reshape(K, F).astype(stem_dtype))
    w2_p = jnp.zeros((Fp, NCp), jnp.float32).at[:F, :NC].set(
        w_fc.astype(jnp.float32))
    b2_p = jnp.zeros((1, NCp), jnp.float32).at[0, :NC].set(
        b_fc.astype(jnp.float32))
    # Block-diagonal mean-pool matrix: row n has 1/P over columns [n*P,(n+1)*P).
    pool_p = jnp.zeros((N, NPp), jnp.float32).at[:, :NP].set(
        jnp.repeat(jnp.eye(N, dtype=jnp.float32), P, axis=1) / float(P))

    nbytes = lambda a: a.size * a.dtype.itemsize
    cost = pl.CostEstimate(
        flops=2 * NPp * Kp * Fp + 2 * N * NPp * Fp + 2 * N * Fp * NCp,
        transcendentals=0,
        bytes_accessed=(nbytes(patches_p) + nbytes(w1_p) + nbytes(pool_p)
                        + nbytes(w2_p) + nbytes(b2_p) + N * NCp * 4),
    )

    out = pl.pallas_call(
        _classifier_kernel,
        out_shape=jax.ShapeDtypeStruct((N, NCp), jnp.float32),
        grid_spec=pltpu.PrefetchScalarGridSpec(
            num_scalar_prefetch=0,
            grid=(1,),                                   # single invocation
            in_specs=[
                pl.BlockSpec((NPp, Kp), lambda i: (0, 0)),
                pl.BlockSpec((Kp, Fp), lambda i: (0, 0)),
                pl.BlockSpec((N, NPp), lambda i: (0, 0)),
                pl.BlockSpec((Fp, NCp), lambda i: (0, 0)),
                pl.BlockSpec((1, NCp), lambda i: (0, 0)),
            ],
            out_specs=pl.BlockSpec((N, NCp), lambda i: (0, 0)),
        ),
        compiler_params=pltpu.CompilerParams(
            dimension_semantics=("arbitrary",)),
        cost_estimate=cost,
    )(patches_p, w1_p, pool_p, w2_p, b2_p)

    # Slice padded lanes back to the real class count.
    return out[:, :NC]


def _reference_forward(x_nchw, params):
    """Pure-JAX f32 reference for correctness checking."""
    x = jnp.transpose(x_nchw, (0, 2, 3, 1))
    feat = jax.lax.conv_general_dilated(
        x, params["w_conv"], window_strides=(1, 1), padding="SAME",
        dimension_numbers=("NHWC", "HWIO", "NHWC"))
    feat = jnp.maximum(feat, 0.0)
    pooled = feat.mean(axis=(1, 2))
    return pooled @ params["w_fc"] + params["b_fc"]


def init_params(key, c_in=4, features=32, num_classes=10):
    """Deterministic synthetic parameters (no checkpoint load)."""
    k1, k2, k3 = jax.random.split(key, 3)
    w_conv = jax.random.normal(k1, (3, 3, c_in, features), jnp.float32) * 0.1
    w_fc = jax.random.normal(k2, (features, num_classes), jnp.float32) * 0.1
    b_fc = jax.random.normal(k3, (num_classes,), jnp.float32) * 0.01
    return {"w_conv": w_conv, "w_fc": w_fc, "b_fc": b_fc}


if __name__ == "__main__":
    key = jax.random.PRNGKey(0)
    k_x, k_p = jax.random.split(key)

    # Small shapes consistent with an image classifier: NCHW input.
    N, C, H, W = 2, 4, 16, 16
    num_classes = 10
    x = jax.random.normal(k_x, (N, C, H, W), jnp.float32)
    params = init_params(k_p, c_in=C, features=32, num_classes=num_classes)

    logits = custom_model_forward(x, params)
    logits = jax.block_until_ready(logits)

    assert logits.shape == (N, num_classes), logits.shape
    assert logits.dtype == jnp.float32
    assert bool(jnp.all(jnp.isfinite(logits)))

    # Loose tolerance: kernel uses bf16 for the stem contraction inputs.
    ref = _reference_forward(x, params)
    assert bool(jnp.allclose(logits, ref, atol=1e-1, rtol=1e-1)), (logits, ref)

    print("KERNEL_OK")
</pallas_src>

<mosaic_0001>
module attributes {stable_mosaic.version = 11 : i64} {
  func.func @_classifier_kernel(%arg0: i32, %arg1: memref<512x128xbf16, #tpu.memory_space<vmem>>, %arg2: memref<128x128xbf16, #tpu.memory_space<vmem>>, %arg3: memref<2x512xf32, #tpu.memory_space<vmem>>, %arg4: memref<128x128xf32, #tpu.memory_space<vmem>>, %arg5: memref<1x128xf32, #tpu.memory_space<vmem>>, %arg6: memref<2x128xf32, #tpu.memory_space<vmem>>) attributes {dimension_semantics = [#tpu.dimension_semantics<arbitrary>], iteration_bounds = array<i64: 1>, scalar_prefetch = 0 : i64, scratch_operands = 0 : i64, tpu.core_type = #tpu.core_type<tc>, window_params = [{pipeline_mode = #tpu.pipeline_mode<synchronous>, transform_indices = @transform_0, window_bounds = array<i64: 512, 128>}, {pipeline_mode = #tpu.pipeline_mode<synchronous>, transform_indices = @transform_1, window_bounds = array<i64: 128, 128>}, {pipeline_mode = #tpu.pipeline_mode<synchronous>, transform_indices = @transform_2, window_bounds = array<i64: 2, 512>}, {pipeline_mode = #tpu.pipeline_mode<synchronous>, transform_indices = @transform_3, window_bounds = array<i64: 128, 128>}, {pipeline_mode = #tpu.pipeline_mode<synchronous>, transform_indices = @transform_4, window_bounds = array<i64: 1, 128>}, {pipeline_mode = #tpu.pipeline_mode<synchronous>, transform_indices = @transform_5, window_bounds = array<i64: 2, 128>}]} {
    %c0 = arith.constant 0 : index
    %c0_0 = arith.constant 0 : index
    %0 = vector.load %arg1[%c0, %c0_0] : memref<512x128xbf16, #tpu.memory_space<vmem>>, vector<512x128xbf16>
    %c0_1 = arith.constant 0 : index
    %c0_2 = arith.constant 0 : index
    %1 = vector.load %arg2[%c0_1, %c0_2] : memref<128x128xbf16, #tpu.memory_space<vmem>>, vector<128x128xbf16>
    %cst = arith.constant dense<0.000000e+00> : vector<512x128xf32>
    %2 = tpu.matmul %0, %1, %cst {dimension_numbers = #tpu.dot_dimension_numbers<[1], [0], [0], [1], [0, 0, 1, 1], [], []>} : vector<512x128xbf16>, vector<128x128xbf16>, vector<512x128xf32> -> vector<512x128xf32>
    %cst_3 = arith.constant 0.000000e+00 : f32
    %3 = vector.broadcast %cst_3 : f32 to vector<512x128xf32>
    %4 = arith.maximumf %2, %3 : vector<512x128xf32>
    %c0_4 = arith.constant 0 : index
    %c0_5 = arith.constant 0 : index
    %5 = vector.load %arg3[%c0_4, %c0_5] : memref<2x512xf32, #tpu.memory_space<vmem>>, vector<2x512xf32>
    %cst_6 = arith.constant dense<0.000000e+00> : vector<2x128xf32>
    %6 = tpu.matmul %5, %4, %cst_6 {dimension_numbers = #tpu.dot_dimension_numbers<[1], [0], [0], [1], [0, 0, 1, 1], [], []>} : vector<2x512xf32>, vector<512x128xf32>, vector<2x128xf32> -> vector<2x128xf32>
    %c0_7 = arith.constant 0 : index
    %c0_8 = arith.constant 0 : index
    %7 = vector.load %arg4[%c0_7, %c0_8] : memref<128x128xf32, #tpu.memory_space<vmem>>, vector<128x128xf32>
    %cst_9 = arith.constant dense<0.000000e+00> : vector<2x128xf32>
    %8 = tpu.matmul %6, %7, %cst_9 {dimension_numbers = #tpu.dot_dimension_numbers<[1], [0], [0], [1], [0, 0, 1, 1], [], []>} : vector<2x128xf32>, vector<128x128xf32>, vector<2x128xf32> -> vector<2x128xf32>
    %c0_10 = arith.constant 0 : index
    %c0_11 = arith.constant 0 : index
    %9 = vector.load %arg5[%c0_10, %c0_11] : memref<1x128xf32, #tpu.memory_space<vmem>>, vector<1x128xf32>
    %10 = vector.broadcast %9 : vector<1x128xf32> to vector<2x128xf32>
    %11 = arith.addf %8, %10 : vector<2x128xf32>
    %c0_12 = arith.constant 0 : index
    %c0_13 = arith.constant 0 : index
    %12 = vector.load %arg6[%c0_12, %c0_13] : memref<2x128xf32, #tpu.memory_space<vmem>>, vector<2x128xf32>
    tpu.vector_store %arg6[%c0_12, %c0_13], %11 {strides = array<i32>} : memref<2x128xf32, #tpu.memory_space<vmem>>, vector<2x128xf32>,
    return
  }
  func.func @transform_0(%arg0: i32) -> (i32, i32) {
    %c0_i32 = arith.constant 0 : i32
    %c0_i32_0 = arith.constant 0 : i32
    %c0_i32_1 = arith.constant 0 : i32
    return %c0_i32, %c0_i32_0 : i32, i32
  }
  func.func @transform_1(%arg0: i32) -> (i32, i32) {
    %c0_i32 = arith.constant 0 : i32
    %c0_i32_0 = arith.constant 0 : i32
    %c0_i32_1 = arith.constant 0 : i32
    return %c0_i32, %c0_i32_0 : i32, i32
  }
  func.func @transform_2(%arg0: i32) -> (i32, i32) {
    %c0_i32 = arith.constant 0 : i32
    %c0_i32_0 = arith.constant 0 : i32
    %c0_i32_1 = arith.constant 0 : i32
    return %c0_i32, %c0_i32_0 : i32, i32
  }
  func.func @transform_3(%arg0: i32) -> (i32, i32) {
    %c0_i32 = arith.constant 0 : i32
    %c0_i32_0 = arith.constant 0 : i32
    %c0_i32_1 = arith.constant 0 : i32
    return %c0_i32, %c0_i32_0 : i32, i32
  }
  func.func @transform_4(%arg0: i32) -> (i32, i32) {
    %c0_i32 = arith.constant 0 : i32
    %c0_i32_0 = arith.constant 0 : i32
    %c0_i32_1 = arith.constant 0 : i32
    return %c0_i32, %c0_i32_0 : i32, i32
  }
  func.func @transform_5(%arg0: i32) -> (i32, i32) {
    %c0_i32 = arith.constant 0 : i32
    %c0_i32_0 = arith.constant 0 : i32
    %c0_i32_1 = arith.constant 0 : i32
    return %c0_i32, %c0_i32_0 : i32, i32
  }
}

</mosaic_0001>

<bundles_post_ra>
// kernel: tpu_custom_call.1
= control target key start
LH: loop header
LB: loop body
LE: loop exit
PB: predicated region body
PF: predicated region fallthrough
CT: control target
= control target key end

     0   :  { %10 = vsyncpa [#allocation3], 0  ;;  %s1698_s0 = inlined_call_operand.hbm [shape: bf16[512,128], index: 0, kind: input, shape index: {}]   ;;  %s1699_s1 = inlined_call_operand.hbm [shape: bf16[128,128], index: 1, kind: input, shape index: {}]   ;;  %s1700_s2 = inlined_call_operand.hbm [shape: f32[2,512], index: 2, kind: input, shape index: {}]   ;;  %s1701_s3 = inlined_call_operand.hbm [shape: f32[128,128], index: 3, kind: input, shape index: {}]   ;;  %s1702_s4 = inlined_call_operand.vmem [shape: f32[1,128], index: 4, kind: input, shape index: {}]   ;;  %s1703_s5 = inlined_call_operand.hbm [shape: f32[2,128], index: 5, kind: output, shape index: {}]  }
   0x1   :  { %11 = vsyncpa [#allocation6], 0 }
   0x2   :  { %12 = vsyncpa [#allocation9], 0 }
   0x3   :  { %13 = vsyncpa [#allocation4], 0  ;;  %s1565_s18 = smov [#allocation5]   ;;  %s1566_s20 = smov [#allocation2]  }
   0x4   :  { %s31_s19 = sshll.u32 %s1565_s18, 4  ;;  %s19_s21 = sshll.u32 %s1566_s20, 4  ;;  %s32_s19 = int_to_ptr.vmem [resolvable:$true] %s31_s19  ;;  %s1608_s21 = int_to_ptr.vmem [resolvable:$true] %s19_s21 }
   0x5   :  { %s1447_s24 = scalar_lea.hbm %s1699_s1, 1024 }
   0x6   :  { %p1448_p0 = scmp.ne.s32.totalorder %s1699_s1, %s1447_s24  ;;  %p1451_p1 = scmp.lt.u32.totalorder %s1447_s24, %s1699_s1 }
   0x8   :  { %p1453_p2 = pnand %p1451_p1, %p1448_p0 }
   0xa   :  { %1456 = shalt.err (!%p1453_p2)
}
   0xb   :  { %s1457_s29 = scalar_lea.vmem %s32_s19, 1024  ;;  %p1462_p4 = scmp.lt.s32.totalorder %s32_s19, %s32_s19 }
   0xc   :  { %p1458_p3 = scmp.ne.s32.totalorder %s32_s19, %s1457_s29  ;;  %p1463_p5 = scmp.lt.s32.totalorder %s1457_s29, %s1457_s29 }
   0xe   :  { %p1464_p6 = por %p1463_p5, %p1462_p4 }
  0x10   :  { %p1465_p7 = pnand %p1464_p6, %p1458_p3 }
  0x12   :  { %1468 = shalt.err (!%p1465_p7)
}
  0x13   :  { %s1567_s30 = smov 64   ;;  %s1568_s6 = smov 4  }
  0x14   :  { %37 = dma.hbm_to_vmem [thread:$0]  %s1699_s1, 1024, %s32_s19, [#allocation6], %s1567_s30, %s1567_s30, %s1568_s6  }
  0x15   :  { %s1469_s11 = scalar_lea.hbm %s1698_s0, 4096 }
  0x16   :  { %p1470_p8 = scmp.ne.s32.totalorder %s1698_s0, %s1469_s11  ;;  %p1473_p9 = scmp.lt.u32.totalorder %s1469_s11, %s1698_s0 }
  0x18   :  { %p1475_p10 = pnand %p1473_p9, %p1470_p8 }
  0x1a   :  { %1478 = shalt.err (!%p1475_p10)
}
  0x1b   :  { %s1479_s16 = scalar_lea.vmem %s1608_s21, 4096  ;;  %p1484_p12 = scmp.lt.s32.totalorder %s1608_s21, %s1608_s21 }
  0x1c   :  { %p1480_p11 = scmp.ne.s32.totalorder %s1608_s21, %s1479_s16  ;;  %p1485_p13 = scmp.lt.s32.totalorder %s1479_s16, %s1479_s16 }
  0x1e   :  { %p1486_p0 = por %p1485_p13, %p1484_p12 }
  0x20   :  { %p1487_p1 = pnand %p1486_p0, %p1480_p11 }
  0x22   :  { %1490 = shalt.err (!%p1487_p1)
}
  0x23   :  { %25 = dma.hbm_to_vmem [thread:$0]  %s1698_s0, 4096, %s1608_s21, [#allocation3], %s1567_s30, %s1567_s30, %s1568_s6  }
  0x24   :  { %s1569_s18 = smov [#allocation7]   ;;  %s1570_s20 = smov [#allocation8]  }
  0x25   :  { %s44_s19 = sshll.u32 %s1569_s18, 4  ;;  %s53_s22 = sshll.u32 %s1570_s20, 4  ;;  %s45_s19 = int_to_ptr.vmem [resolvable:$true] %s44_s19  ;;  %s1639_s22 = int_to_ptr.vmem [resolvable:$true] %s53_s22 }
  0x26   :  { %s1491_s25 = scalar_lea.hbm %s1700_s2, 128 }
  0x27   :  { %p1492_p2 = scmp.ne.s32.totalorder %s1700_s2, %s1491_s25  ;;  %p1495_p3 = scmp.lt.u32.totalorder %s1491_s25, %s1700_s2 }
  0x29   :  { %p1497_p4 = pnand %p1495_p3, %p1492_p2 }
  0x2b   :  { %1500 = shalt.err (!%p1497_p4)
}
  0x2c   :  { %s1501_s0 = scalar_lea.vmem %s45_s19, 128  ;;  %p1506_p6 = scmp.lt.s32.totalorder %s45_s19, %s45_s19 }
  0x2d   :  { %p1502_p5 = scmp.ne.s32.totalorder %s45_s19, %s1501_s0  ;;  %p1507_p7 = scmp.lt.s32.totalorder %s1501_s0, %s1501_s0 }
  0x2f   :  { %p1508_p8 = por %p1507_p7, %p1506_p6 }
  0x31   :  { %p1509_p9 = pnand %p1508_p8, %p1502_p5 }
  0x33   :  { %1512 = shalt.err (!%p1509_p9)
}
  0x34   :  { %47 = dma.hbm_to_vmem [thread:$0]  %s1700_s2, 128, %s45_s19, [#allocation6]  }
  0x35   :  { %s1513_s8 = scalar_lea.hbm %s1701_s3, 2048 }
  0x36   :  { %p1514_p10 = scmp.ne.s32.totalorder %s1701_s3, %s1513_s8  ;;  %p1517_p11 = scmp.lt.u32.totalorder %s1513_s8, %s1701_s3 }
  0x38   :  { %p1519_p12 = pnand %p1517_p11, %p1514_p10 }
  0x3a   :  { %1522 = shalt.err (!%p1519_p12)
}
  0x3b   :  { %s1523_s13 = scalar_lea.vmem %s1639_s22, 2048  ;;  %p1528_p0 = scmp.lt.s32.totalorder %s1639_s22, %s1639_s22 }
  0x3c   :  { %p1524_p13 = scmp.ne.s32.totalorder %s1639_s22, %s1523_s13  ;;  %p1529_p1 = scmp.lt.s32.totalorder %s1523_s13, %s1523_s13 }
  0x3e   :  { %p1530_p2 = por %p1529_p1, %p1528_p0 }
  0x40   :  { %p1531_p3 = pnand %p1530_p2, %p1524_p13 }
  0x42   :  { %1534 = shalt.err (!%p1531_p3)
}
  0x43   :  { %s1571_s2 = smov 128   ;;  %s1572_s14 = smov 8  }
  0x44   :  { %59 = dma.hbm_to_vmem [thread:$0]  %s1701_s3, 2048, %s1639_s22, [#allocation9], %s1571_s2, %s1571_s2, %s1572_s14  }
  0x45   :  { %1557 = dma.done.wait [#allocation3], 4096  }
  0x46   :  { %1558 = vsyncadd [#allocation3], 4294963200 }
  0x47   :  { %1559 = dma.done.wait [#allocation6], 1152  }
  0x48   :  { %1560 = vsyncadd [#allocation6], 4294966144 }
  0x49   :  { %1561 = dma.done.wait [#allocation9], 2048  }
  0x4a   :  { %1562 = vsyncadd [#allocation9], 4294965248  ;;  %v1406_v0 = vld [vmem:[#allocation5] sm:$0xff]   ;;  %v1407_v1 = vld [vmem:[#allocation5 + $0x8] sm:$0xff]   ;;  %v1573_v40 = vmov 1983009808   ;;  %v754_v42 = vlaneseq }
  0x4b   :  { %1190 = vmatprep.subr.bf16.mxu0 %v1406_v0  ;;  %v1408_v2 = vld [vmem:[#allocation5 + $0x10] sm:$0xff]   ;;  %v1409_v3 = vld [vmem:[#allocation5 + $0x18] sm:$0xff]   ;;  %v1414_v4 = vld [vmem:[#allocation2] sm:$0xff]   ;;  %v752_v41 = vunpack.c.l.s4 %v1573_v40  ;;  %vm1575_vm0 = vmmov 0   ;;  %s1577_s17 = smov [#allocation10]  }
  0x4c   :  { %1191 = vmatpush3.bf16.msra.mxu0 %v1406_v0  ;;  %1206 = vmatprep.mubr.bf16.mxu0 %v1414_v4  ;;  %v1410_v5 = vld [vmem:[#allocation5 + $0x20] sm:$0xff]   ;;  %v1411_v6 = vld [vmem:[#allocation5 + $0x28] sm:$0xff]   ;;  %v1412_v7 = vld [vmem:[#allocation5 + $0x30] sm:$0xff]   ;;  %v755_v44 = vshrl.u32 %v754_v42, 7  ;;  %s1011_s18 = sshll.u32 %s1577_s17, 4  ;;  %s1012_s18 = int_to_ptr.vmem [resolvable:$true] %s1011_s18 }
  0x4d   :  { %1192 = vmatprep.subr.bf16.mxu0 %v1407_v1  ;;  %v1413_v8 = vld [vmem:[#allocation5 + $0x38] sm:$0xff]   ;;  %v1415_v9 = vld [vmem:[#allocation2 + $0x8] sm:$0xff]   ;;  %v1416_v10 = vld [vmem:[#allocation2 + $0x10] sm:$0xff]   ;;  %v753_v43 = vunpack.c.0.s8 %v752_v41  ;;  %s1535_s19 = scalar_lea.vmem %s1012_s18, 32  ;;  %p1540_p5 = scmp.lt.s32.totalorder %s1012_s18, %s1012_s18 }
  0x4e   :  { %v1417_v11 = vld [vmem:[#allocation2 + $0x18] sm:$0xff]   ;;  %v1418_v12 = vld [vmem:[#allocation2 + $0x20] sm:$0xff]   ;;  %v1419_v13 = vld [vmem:[#allocation2 + $0x28] sm:$0xff]   ;;  %p1536_p4 = scmp.ne.s32.totalorder %s1012_s18, %s1535_s19  ;;  %p1541_p6 = scmp.lt.s32.totalorder %s1535_s19, %s1535_s19 }
  0x4f   :  { %v1420_v14 = vld [vmem:[#allocation2 + $0x30] sm:$0xff]   ;;  %v1421_v15 = vld [vmem:[#allocation2 + $0x38] sm:$0xff]   ;;  %v1422_v16 = vld [vmem:[#allocation2 + $0x40] sm:$0xff]   ;;  %v756_v45 = vsub.s32 %v753_v43, %v755_v44 }
  0x50   :  { %1193 = vmatpush3.bf16.msra.mxu0 %v1407_v1  ;;  %v1423_v17 = vld [vmem:[#allocation2 + $0x48] sm:$0xff]   ;;  %v1424_v18 = vld [vmem:[#allocation2 + $0x50] sm:$0xff]   ;;  %v1425_v19 = vld [vmem:[#allocation2 + $0x58] sm:$0xff]   ;;  %p1542_p7 = por %p1541_p6, %p1540_p5 }
  0x51   :  { %1194 = vmatprep.subr.bf16.mxu0 %v1408_v2  ;;  %v1426_v20 = vld [vmem:[#allocation2 + $0x60] sm:$0xff]   ;;  %v1427_v21 = vld [vmem:[#allocation2 + $0x68] sm:$0xff]   ;;  %v1428_v22 = vld [vmem:[#allocation2 + $0x70] sm:$0xff]  }
  0x52   :  { %v1429_v23 = vld [vmem:[#allocation2 + $0x78] sm:$0xff]   ;;  %v1430_v24 = vld [vmem:[#allocation2 + $0x80] sm:$0xff]   ;;  %v1431_v25 = vld [vmem:[#allocation2 + $0x88] sm:$0xff]   ;;  %p1543_p8 = pnand %p1542_p7, %p1536_p4 }
  0x53   :  { %v1432_v26 = vld [vmem:[#allocation2 + $0x90] sm:$0xff]   ;;  %v1433_v27 = vld [vmem:[#allocation2 + $0x98] sm:$0xff]   ;;  %v1434_v28 = vld [vmem:[#allocation2 + $0xa0] sm:$0xff]  }
  0x54   :  { %1195 = vmatpush3.bf16.msra.mxu0 %v1408_v2  ;;  %v1435_v29 = vld [vmem:[#allocation2 + $0xa8] sm:$0xff]   ;;  %v1436_v30 = vld [vmem:[#allocation2 + $0xb0] sm:$0xff]   ;;  %v1437_v31 = vld [vmem:[#allocation2 + $0xb8] sm:$0xff]  }
  0x55   :  { %1196 = vmatprep.subr.bf16.mxu0 %v1409_v3  ;;  %v1438_v32 = vld [vmem:[#allocation2 + $0xc0] sm:$0xff]   ;;  %v1439_v33 = vld [vmem:[#allocation2 + $0xc8] sm:$0xff]   ;;  %v1440_v34 = vld [vmem:[#allocation2 + $0xd0] sm:$0xff]  }
  0x56   :  { %v1441_v35 = vld [vmem:[#allocation2 + $0xd8] sm:$0xff]   ;;  %v1442_v36 = vld [vmem:[#allocation2 + $0xe0] sm:$0xff]   ;;  %v1443_v37 = vld [vmem:[#allocation2 + $0xe8] sm:$0xff]  }
  0x57   :  { %v1444_v38 = vld [vmem:[#allocation2 + $0xf0] sm:$0xff]   ;;  %v1445_v39 = vld [vmem:[#allocation2 + $0xf8] sm:$0xff]   ;;  %v748_v46 = vld [vmem:[#allocation7] sm:$0xff] }
  0x58   :  { %1197 = vmatpush3.bf16.msra.mxu0 %v1409_v3  ;;  %v1670_v47 = vrot.slane %v748_v46, %v756_v45  ;;  %v750_v49 = vcombine.high %v748_v46, %v748_v46 }
  0x59   :  { %1198 = vmatprep.subr.bf16.mxu0 %v1410_v5 }
  0x5a   :  { %v765_v48 = vcombine.high %v1670_v47, %v1670_v47  ;;  %v1674_v56 = vrot.slane %v750_v49, %v756_v45 }
  0x5c   :  { %1199 = vmatpush3.bf16.msra.mxu0 %v1410_v5  ;;  %835 = vmatprep.mubr.f32.mxu1 %v765_v48 }
  0x5d   :  { %1200 = vmatprep.subr.bf16.mxu0 %v1411_v6 }
  0x60   :  { %1201 = vmatpush3.bf16.msra.mxu0 %v1411_v6 }
  0x61   :  { %1202 = vmatprep.subr.bf16.mxu0 %v1412_v7 }
  0x64   :  { %1203 = vmatpush3.bf16.msra.mxu0 %v1412_v7 }
  0x65   :  { %1204 = vmatprep.subr.bf16.mxu0 %v1413_v8 }
  0x68   :  { %1205 = vmatpush3.bf16.msra.mxu0 %v1413_v8 }
  0x6b   :  { %1207 = vmatmul.mubr.bf16.vlgmr.msra.gmra.mrb[0].mxu0 %v1415_v9 }
  0x6c   :  { %1210 = vmatprep.mubr.bf16.mxu0 %v1416_v10 }
  0x73   :  { %1211 = vmatmul.mubr.bf16.gmra.mrb[4].mxu0 %v1417_v11 }
  0x74   :  { %1214 = vmatprep.mubr.bf16.mxu0 %v1418_v12 }
  0x7b   :  { %1215 = vmatmul.mubr.bf16.gmra.mrb[8].mxu0 %v1419_v13 }
  0x7c   :  { %1218 = vmatprep.mubr.bf16.mxu0 %v1420_v14 }
  0x83   :  { %1219 = vmatmul.mubr.bf16.gmra.mrb[12].mxu0 %v1421_v15 }
  0x84   :  { %1222 = vmatprep.mubr.bf16.mxu0 %v1422_v16 }
  0x8b   :  { %1223 = vmatmul.mubr.bf16.gmra.mrb[16].mxu0 %v1423_v17 }
  0x8c   :  { %1226 = vmatprep.mubr.bf16.mxu0 %v1424_v18 }
  0x93   :  { %1227 = vmatmul.mubr.bf16.gmra.mrb[20].mxu0 %v1425_v19 }
  0x94   :  { %1230 = vmatprep.mubr.bf16.mxu0 %v1426_v20 }
  0x9b   :  { %1231 = vmatmul.mubr.bf16.gmra.mrb[24].mxu0 %v1427_v21 }
  0x9c   :  { %1234 = vmatprep.mubr.bf16.mxu0 %v1428_v22 }
  0xa3   :  { %1235 = vmatmul.mubr.bf16.gmra.mrb[28].mxu0 %v1429_v23 }
  0xa4   :  { %1238 = vmatprep.mubr.bf16.mxu0 %v1430_v24 }
  0xab   :  { %1239 = vmatmul.mubr.bf16.gmra.mrb[32].mxu0 %v1431_v25 }
  0xac   :  { %1242 = vmatprep.mubr.bf16.mxu0 %v1432_v26 }
  0xb3   :  { %1243 = vmatmul.mubr.bf16.gmra.mrb[36].mxu0 %v1433_v27 }
  0xb4   :  { %1246 = vmatprep.mubr.bf16.mxu0 %v1434_v28 }
  0xbb   :  { %1247 = vmatmul.mubr.bf16.gmra.mrb[40].mxu0 %v1435_v29 }
  0xbc   :  { %1250 = vmatprep.mubr.bf16.mxu0 %v1436_v30 }
  0xc3   :  { %1251 = vmatmul.mubr.bf16.gmra.mrb[44].mxu0 %v1437_v31 }
  0xc4   :  { %1254 = vmatprep.mubr.bf16.mxu0 %v1438_v32 }
  0xcb   :  { %1255 = vmatmul.mubr.bf16.gmra.mrb[48].mxu0 %v1439_v33 }
  0xcc   :  { %1258 = vmatprep.mubr.bf16.mxu0 %v1440_v34 }
  0xd3   :  { %1259 = vmatmul.mubr.bf16.gmra.mrb[52].mxu0 %v1441_v35 }
  0xd4   :  { %1262 = vmatprep.mubr.bf16.mxu0 %v1442_v36 }
  0xdb   :  { %1263 = vmatmul.mubr.bf16.gmra.mrb[56].mxu0 %v1443_v37 }
  0xdc   :  { %1266 = vmatprep.mubr.bf16.mxu0 %v1444_v38 }
  0xe3   :  { %1267 = vmatmul.mubr.bf16.gmra.mrb[60].mxu0 %v1445_v39 }
 0x13e   :  { %v1208_v50 = vpop.f32.mrb[0].mxu0 }
 0x13f   :  { %v429_v51 = vpop.f32.mrb[1].mxu0  ;;  %v686_v53 = vmax.f32 %v1208_v50, 0.0 }
 0x140   :  { %v1209_v52 = vpop.f32.mrb[2].mxu0  ;;  %v684_v57 = vmax.f32 %v429_v51, 0.0 }
 0x141   :  { %v687_v54 = vmax.f32 %v1209_v52, 0.0  ;;  %v432_v55 = vpop.f32.mrb[3].mxu0 }
 0x142   :  { %v685_v58 = vmax.f32 %v432_v55, 0.0 }
 0x143   :  { %v1311_v59 = vpack.c.bf16 %v687_v54, %v686_v53 }
 0x144   :  { %v1307_v60 = vpack.c.bf16 %v685_v58, %v684_v57 }
 0x146   :  { %v1212_v61 = vpop.f32.mrb[4].mxu0 }
 0x147   :  { %v445_v62 = vpop.f32.mrb[5].mxu0  ;;  %v690_v0 = vmax.f32 %v1212_v61, 0.0 }
 0x148   :  { %v1213_v63 = vpop.f32.mrb[6].mxu0  ;;  %v688_v3 = vmax.f32 %v445_v62, 0.0 }
 0x149   :  { %v691_v1 = vmax.f32 %v1213_v63, 0.0  ;;  %v448_v2 = vpop.f32.mrb[7].mxu0 }
 0x14a   :  { %v689_v4 = vmax.f32 %v448_v2, 0.0 }
 0x14b   :  { %v1319_v5 = vpack.c.bf16 %v691_v1, %v690_v0 }
 0x14c   :  { %v1315_v6 = vpack.c.bf16 %v689_v4, %v688_v3 }
 0x14e   :  { %v1216_v7 = vpop.f32.mrb[8].mxu0 }
 0x14f   :  { %v461_v8 = vpop.f32.mrb[9].mxu0  ;;  %v694_v10 = vmax.f32 %v1216_v7, 0.0 }
 0x150   :  { %v1217_v9 = vpop.f32.mrb[10].mxu0  ;;  %v692_v13 = vmax.f32 %v461_v8, 0.0 }
 0x151   :  { %v695_v11 = vmax.f32 %v1217_v9, 0.0  ;;  %v464_v12 = vpop.f32.mrb[11].mxu0 }
 0x152   :  { %v693_v14 = vmax.f32 %v464_v12, 0.0 }
 0x153   :  { %v1327_v15 = vpack.c.bf16 %v695_v11, %v694_v10 }
 0x154   :  { %v1323_v16 = vpack.c.bf16 %v693_v14, %v692_v13  ;;  %v766_v14 = vcombine.high %v1674_v56, %v1674_v56 }
 0x156   :  { %v1220_v17 = vpop.f32.mrb[12].mxu0 }
 0x157   :  { %v477_v18 = vpop.f32.mrb[13].mxu0  ;;  %v698_v20 = vmax.f32 %v1220_v17, 0.0 }
 0x158   :  { %v1221_v19 = vpop.f32.mrb[14].mxu0  ;;  %v696_v23 = vmax.f32 %v477_v18, 0.0 }
 0x159   :  { %v699_v21 = vmax.f32 %v1221_v19, 0.0  ;;  %v480_v22 = vpop.f32.mrb[15].mxu0 }
 0x15a   :  { %v697_v24 = vmax.f32 %v480_v22, 0.0 }
 0x15b   :  { %v1676_v25 = vpack.c.bf16 %v699_v21, %v698_v20 }
 0x15c   :  { %v1331_v26 = vpack.c.bf16 %v697_v24, %v696_v23 }
 0x15e   :  { %v1224_v27 = vpop.f32.mrb[16].mxu0 }
 0x15f   :  { %v493_v28 = vpop.f32.mrb[17].mxu0  ;;  %v702_v30 = vmax.f32 %v1224_v27, 0.0 }
 0x160   :  { %v1225_v29 = vpop.f32.mrb[18].mxu0  ;;  %v700_v33 = vmax.f32 %v493_v28, 0.0 }
 0x161   :  { %v703_v31 = vmax.f32 %v1225_v29, 0.0  ;;  %v496_v32 = vpop.f32.mrb[19].mxu0 }
 0x162   :  { %v701_v34 = vmax.f32 %v496_v32, 0.0 }
 0x163   :  { %v1309_v35 = vpack.c.bf16 %v703_v31, %v702_v30 }
 0x164   :  { %v1305_v36 = vpack.c.bf16 %v701_v34, %v700_v33 }
 0x166   :  { %v1228_v37 = vpop.f32.mrb[20].mxu0  ;;  %1306 = vmatprep.subr.bf16.mxu1 %v1305_v36 }
 0x167   :  { %v509_v38 = vpop.f32.mrb[21].mxu0  ;;  %1308 = vmatpush3.bf16.msra.mxu1 %v1307_v60  ;;  %v706_v40 = vmax.f32 %v1228_v37, 0.0 }
 0x168   :  { %v1229_v39 = vpop.f32.mrb[22].mxu0  ;;  %1310 = vmatprep.subr.bf16.mxu1 %v1309_v35  ;;  %v704_v43 = vmax.f32 %v509_v38, 0.0 }
 0x169   :  { %v707_v41 = vmax.f32 %v1229_v39, 0.0  ;;  %v512_v42 = vpop.f32.mrb[23].mxu0 }
 0x16a   :  { %v705_v44 = vmax.f32 %v512_v42, 0.0 }
 0x16b   :  { %v1317_v45 = vpack.c.bf16 %v707_v41, %v706_v40  ;;  %1312 = vmatpush3.bf16.msra.mxu1 %v1311_v59 }
 0x16c   :  { %v1313_v46 = vpack.c.bf16 %v705_v44, %v704_v43 }
 0x16e   :  { %v1232_v48 = vpop.f32.mrb[24].mxu0  ;;  %1314 = vmatprep.subr.bf16.mxu1 %v1313_v46 }
 0x16f   :  { %v525_v49 = vpop.f32.mrb[25].mxu0  ;;  %1316 = vmatpush3.bf16.msra.mxu1 %v1315_v6  ;;  %v710_v51 = vmax.f32 %v1232_v48, 0.0 }
 0x170   :  { %v1233_v50 = vpop.f32.mrb[26].mxu0  ;;  %1318 = vmatprep.subr.bf16.mxu1 %v1317_v45  ;;  %v708_v54 = vmax.f32 %v525_v49, 0.0 }
 0x171   :  { %v711_v52 = vmax.f32 %v1233_v50, 0.0  ;;  %v528_v53 = vpop.f32.mrb[27].mxu0 }
 0x172   :  { %v709_v55 = vmax.f32 %v528_v53, 0.0 }
 0x173   :  { %v1325_v57 = vpack.c.bf16 %v711_v52, %v710_v51  ;;  %1320 = vmatpush3.bf16.msra.mxu1 %v1319_v5 }
 0x174   :  { %v1321_v58 = vpack.c.bf16 %v709_v55, %v708_v54 }
 0x176   :  { %v1236_v60 = vpop.f32.mrb[28].mxu0  ;;  %1322 = vmatprep.subr.bf16.mxu1 %v1321_v58 }
 0x177   :  { %v541_v61 = vpop.f32.mrb[29].mxu0  ;;  %1324 = vmatpush3.bf16.msra.mxu1 %v1323_v16  ;;  %v714_v62 = vmax.f32 %v1236_v60, 0.0 }
 0x178   :  { %v1237_v59 = vpop.f32.mrb[30].mxu0  ;;  %1326 = vmatprep.subr.bf16.mxu1 %v1325_v57  ;;  %v712_v1 = vmax.f32 %v541_v61, 0.0 }
 0x179   :  { %v715_v63 = vmax.f32 %v1237_v59, 0.0  ;;  %v544_v0 = vpop.f32.mrb[31].mxu0 }
 0x17a   :  { %v713_v2 = vmax.f32 %v544_v0, 0.0 }
 0x17b   :  { %v1333_v3 = vpack.c.bf16 %v715_v63, %v714_v62  ;;  %1328 = vmatpush3.bf16.msra.mxu1 %v1327_v15 }
 0x17c   :  { %v1329_v4 = vpack.c.bf16 %v713_v2, %v712_v1 }
 0x17e   :  { %v1240_v6 = vpop.f32.mrb[32].mxu0  ;;  %1330 = vmatprep.subr.bf16.mxu1 %v1329_v4 }
 0x17f   :  { %v557_v7 = vpop.f32.mrb[33].mxu0  ;;  %1332 = vmatpush3.bf16.msra.mxu1 %v1331_v26  ;;  %v718_v8 = vmax.f32 %v1240_v6, 0.0 }
 0x180   :  { %v1241_v5 = vpop.f32.mrb[34].mxu0  ;;  %1334 = vmatprep.subr.bf16.mxu1 %v1333_v3  ;;  %v716_v11 = vmax.f32 %v557_v7, 0.0 }
 0x181   :  { %v719_v9 = vmax.f32 %v1241_v5, 0.0  ;;  %v560_v10 = vpop.f32.mrb[35].mxu0 }
 0x182   :  { %v717_v12 = vmax.f32 %v560_v10, 0.0 }
 0x183   :  { %v1343_v13 = vpack.c.bf16 %v719_v9, %v718_v8  ;;  %1336 = vmatpush3.bf16.msra.mxu1 %v1676_v25 }
 0x184   :  { %v1339_v16 = vpack.c.bf16 %v717_v12, %v716_v11 }
 0x186   :  { %v1244_v15 = vpop.f32.mrb[36].mxu0  ;;  %836 = vmatmul.mubr.f32.vlgmr.msra.gmra.mrb[0].mxu1 %v1670_v47 }
 0x187   :  { %v573_v17 = vpop.f32.mrb[37].mxu0  ;;  %905 = vmatprep.mubr.f32.mxu1 %v766_v14  ;;  %v722_v19 = vmax.f32 %v1244_v15, 0.0 }
 0x188   :  { %v1245_v18 = vpop.f32.mrb[38].mxu0  ;;  %v720_v22 = vmax.f32 %v573_v17, 0.0 }
 0x189   :  { %v723_v20 = vmax.f32 %v1245_v18, 0.0  ;;  %v576_v21 = vpop.f32.mrb[39].mxu0 }
 0x18a   :  { %v721_v23 = vmax.f32 %v576_v21, 0.0 }
 0x18b   :  { %v1351_v24 = vpack.c.bf16 %v723_v20, %v722_v19 }
 0x18c   :  { %v1347_v26 = vpack.c.bf16 %v721_v23, %v720_v22  ;;  %v911_v23 = vld [vmem:[#allocation8] sm:$0xff] }
 0x18e   :  { %v1248_v27 = vpop.f32.mrb[40].mxu0 }
 0x18f   :  { %v589_v28 = vpop.f32.mrb[41].mxu0  ;;  %v726_v29 = vmax.f32 %v1248_v27, 0.0  ;;  %v1574_v27 = vmov 0.0|0.0  }
 0x190   :  { %v1249_v25 = vpop.f32.mrb[42].mxu0  ;;  %v724_v32 = vmax.f32 %v589_v28, 0.0 }
 0x191   :  { %v727_v30 = vmax.f32 %v1249_v25, 0.0  ;;  %v592_v31 = vpop.f32.mrb[43].mxu0  ;;  %v914_v25 = vld [vmem:[#allocation8 + $0x18] sm:$0xff] }
 0x192   :  { %v725_v33 = vmax.f32 %v592_v31, 0.0  ;;  %v916_v31 = vld [vmem:[#allocation8 + $0x28] sm:$0xff] }
 0x193   :  { %v1359_v34 = vpack.c.bf16 %v727_v30, %v726_v29  ;;  %v915_v30 = vld [vmem:[#allocation8 + $0x20] sm:$0xff] }
 0x194   :  { %v1355_v47 = vpack.c.bf16 %v725_v33, %v724_v32  ;;  %v1376_v32 = vpack.c.bf16 %v916_v31, %v915_v30  ;;  %v917_v33 = vld [vmem:[#allocation8 + $0x30] sm:$0xff] }
 0x196   :  { %v1252_v35 = vpop.f32.mrb[44].mxu0 }
 0x197   :  { %v605_v36 = vpop.f32.mrb[45].mxu0  ;;  %v730_v38 = vmax.f32 %v1252_v35, 0.0  ;;  %v920_v35 = vld [vmem:[#allocation8 + $0x48] sm:$0xff] }
 0x198   :  { %v1253_v37 = vpop.f32.mrb[46].mxu0  ;;  %v728_v41 = vmax.f32 %v605_v36, 0.0 }
 0x199   :  { %v731_v39 = vmax.f32 %v1253_v37, 0.0  ;;  %v608_v40 = vpop.f32.mrb[47].mxu0  ;;  %v921_v37 = vld [vmem:[#allocation8 + $0x50] sm:$0xff] }
 0x19a   :  { %v729_v42 = vmax.f32 %v608_v40, 0.0  ;;  %v923_v40 = vld [vmem:[#allocation8 + $0x60] sm:$0xff] }
 0x19b   :  { %v1367_v43 = vpack.c.bf16 %v731_v39, %v730_v38  ;;  %v922_v38 = vld [vmem:[#allocation8 + $0x58] sm:$0xff] }
 0x19c   :  { %v1363_v44 = vpack.c.bf16 %v729_v42, %v728_v41  ;;  %v1385_v39 = vpack.c.bf16 %v922_v38, %v921_v37  ;;  %v924_v41 = vld [vmem:[#allocation8 + $0x68] sm:$0xff] }
 0x19d   :  { %v1388_v42 = vpack.c.bf16 %v924_v41, %v923_v40 }
 0x19e   :  { %v1256_v45 = vpop.f32.mrb[48].mxu0 }
 0x19f   :  { %v621_v46 = vpop.f32.mrb[49].mxu0  ;;  %v734_v49 = vmax.f32 %v1256_v45, 0.0 }
 0x1a0   :  { %v1257_v48 = vpop.f32.mrb[50].mxu0  ;;  %v732_v52 = vmax.f32 %v621_v46, 0.0  ;;  %v1576_v46 = vmov 0.0  }
 0x1a1   :  { %v735_v50 = vmax.f32 %v1257_v48, 0.0  ;;  %v624_v51 = vpop.f32.mrb[51].mxu0 }
 0x1a2   :  { %v733_v53 = vmax.f32 %v624_v51, 0.0 }
 0x1a3   :  { %v1341_v54 = vpack.c.bf16 %v735_v50, %v734_v49 }
 0x1a4   :  { %v1337_v55 = vpack.c.bf16 %v733_v53, %v732_v52 }
 0x1a6   :  { %v1260_v57 = vpop.f32.mrb[52].mxu0  ;;  %1338 = vmatprep.subr.bf16.mxu1 %v1337_v55  ;;  %v1062_v55 = vld [vmem:[%s1702_s4] ss:$0 sm:$0xff] }
 0x1a7   :  { %v637_v58 = vpop.f32.mrb[53].mxu0  ;;  %1340 = vmatpush3.bf16.msra.mxu1 %v1339_v16  ;;  %v738_v61 = vmax.f32 %v1260_v57, 0.0 }
 0x1a8   :  { %v1261_v60 = vpop.f32.mrb[54].mxu0  ;;  %1342 = vmatprep.subr.bf16.mxu1 %v1341_v54  ;;  %v736_v63 = vmax.f32 %v637_v58, 0.0 }
 0x1a9   :  { %v739_v59 = vmax.f32 %v1261_v60, 0.0  ;;  %v640_v62 = vpop.f32.mrb[55].mxu0 }
 0x1aa   :  { %v737_v0 = vmax.f32 %v640_v62, 0.0 }
 0x1ab   :  { %v1349_v1 = vpack.c.bf16 %v739_v59, %v738_v61  ;;  %1344 = vmatpush3.bf16.msra.mxu1 %v1343_v13 }
 0x1ac   :  { %v1345_v2 = vpack.c.bf16 %v737_v0, %v736_v63 }
 0x1ae   :  { %v1264_v3 = vpop.f32.mrb[56].mxu0  ;;  %1346 = vmatprep.subr.bf16.mxu1 %v1345_v2 }
 0x1af   :  { %v653_v4 = vpop.f32.mrb[57].mxu0  ;;  %1348 = vmatpush3.bf16.msra.mxu1 %v1347_v26  ;;  %v742_v7 = vmax.f32 %v1264_v3, 0.0  ;;  %v913_v26 = vld [vmem:[#allocation8 + $0x10] sm:$0xff] }
 0x1b0   :  { %v1265_v6 = vpop.f32.mrb[58].mxu0  ;;  %1350 = vmatprep.subr.bf16.mxu1 %v1349_v1  ;;  %v740_v9 = vmax.f32 %v653_v4, 0.0  ;;  %v1373_v29 = vpack.c.bf16 %v914_v25, %v913_v26 }
 0x1b1   :  { %v743_v5 = vmax.f32 %v1265_v6, 0.0  ;;  %v656_v8 = vpop.f32.mrb[59].mxu0 }
 0x1b2   :  { %v741_v10 = vmax.f32 %v656_v8, 0.0 }
 0x1b3   :  { %v1357_v11 = vpack.c.bf16 %v743_v5, %v742_v7  ;;  %1352 = vmatpush3.bf16.msra.mxu1 %v1351_v24  ;;  %v912_v24 = vld [vmem:[#allocation8 + $0x8] sm:$0xff] }
 0x1b4   :  { %v1353_v12 = vpack.c.bf16 %v741_v10, %v740_v9  ;;  %v1370_v28 = vpack.c.bf16 %v912_v24, %v911_v23 }
 0x1b6   :  { %v1268_v14 = vpop.f32.mrb[60].mxu0  ;;  %1354 = vmatprep.subr.bf16.mxu1 %v1353_v12 }
 0x1b7   :  { %v669_v16 = vpop.f32.mrb[61].mxu0  ;;  %1356 = vmatpush3.bf16.msra.mxu1 %v1355_v47  ;;  %v746_v15 = vmax.f32 %v1268_v14, 0.0 }
 0x1b8   :  { %v1269_v13 = vpop.f32.mrb[62].mxu0  ;;  %1358 = vmatprep.subr.bf16.mxu1 %v1357_v11  ;;  %v744_v19 = vmax.f32 %v669_v16, 0.0 }
 0x1b9   :  { %v747_v17 = vmax.f32 %v1269_v13, 0.0  ;;  %v672_v18 = vpop.f32.mrb[63].mxu0 }
 0x1ba   :  { %v745_v20 = vmax.f32 %v672_v18, 0.0 }
 0x1bb   :  { %v1365_v21 = vpack.c.bf16 %v747_v17, %v746_v15  ;;  %1360 = vmatpush3.bf16.msra.mxu1 %v1359_v34  ;;  %v918_v34 = vld [vmem:[#allocation8 + $0x38] sm:$0xff] }
 0x1bc   :  { %v1361_v22 = vpack.c.bf16 %v745_v20, %v744_v19  ;;  %v1379_v47 = vpack.c.bf16 %v918_v34, %v917_v33 }
 0x1be   :  { %1362 = vmatprep.subr.bf16.mxu1 %v1361_v22 }
 0x1bf   :  { %1364 = vmatpush3.bf16.msra.mxu1 %v1363_v44  ;;  %v926_v44 = vld [vmem:[#allocation8 + $0x78] sm:$0xff] }
 0x1c0   :  { %1366 = vmatprep.subr.bf16.mxu1 %v1365_v21 }
 0x1c3   :  { %1368 = vmatpush3.bf16.msra.mxu1 %v1367_v43  ;;  %v925_v43 = vld [vmem:[#allocation8 + $0x70] sm:$0xff] }
 0x1c4   :  { %1369 = vmatprep.subr.bf16.mxu1 %v1574_v27  ;;  %v1391_v45 = vpack.c.bf16 %v926_v44, %v925_v43 }
 0x1c6   :  { %906 = vmatmul.mubr.f32.vlgmr.msra.gmra.mrb[2].mxu1 %v1674_v56  ;;  %v919_v56 = vld [vmem:[#allocation8 + $0x40] sm:$0xff] }
 0x1c7   :  { %1371 = vmatpush3.bf16.msra.mxu1 %v1370_v28  ;;  %v1382_v36 = vpack.c.bf16 %v920_v35, %v919_v56  ;;  %1302 = vmatprep.mubr.msk.f32.mxu1 %vm1575_vm0, %v1576_v46 }
 0x1c8   :  { %1372 = vmatprep.subr.bf16.mxu1 %v1574_v27 }
 0x1cb   :  { %1374 = vmatpush3.bf16.msra.mxu1 %v1373_v29 }
 0x1cc   :  { %1375 = vmatprep.subr.bf16.mxu1 %v1574_v27 }
 0x1cf   :  { %1377 = vmatpush3.bf16.msra.mxu1 %v1376_v32 }
 0x1d0   :  { %1378 = vmatprep.subr.bf16.mxu1 %v1574_v27 }
 0x1d3   :  { %1380 = vmatpush3.bf16.msra.mxu1 %v1379_v47 }
 0x1d4   :  { %1381 = vmatprep.subr.bf16.mxu1 %v1574_v27 }
 0x1d7   :  { %1383 = vmatpush3.bf16.msra.mxu1 %v1382_v36 }
 0x1d8   :  { %1384 = vmatprep.subr.bf16.mxu1 %v1574_v27 }
 0x1db   :  { %1386 = vmatpush3.bf16.msra.mxu1 %v1385_v39 }
 0x1dc   :  { %1387 = vmatprep.subr.bf16.mxu1 %v1574_v27 }
 0x1df   :  { %1389 = vmatpush3.bf16.msra.mxu1 %v1388_v42 }
 0x1e0   :  { %1390 = vmatprep.subr.bf16.mxu1 %v1574_v27 }
 0x1e3   :  { %1392 = vmatpush3.bf16.msra.mxu1 %v1391_v45 }
 0x259   :  { %v1135_v48 = vpop.f32.mrb[0].mxu1 }
 0x25a   :  { %v1136_v49 = vpop.f32.mrb[1].mxu1 }
 0x25b   :  { %v1137_v50 = vadd.f32 %v1136_v49, %v1135_v48 }
 0x299   :  { %v1170_v51 = vpop.f32.mrb[2].mxu1 }
 0x29a   :  { %v1171_v52 = vpop.f32.mrb[3].mxu1 }
 0x29b   :  { %v1172_v53 = vadd.f32 %v1171_v52, %v1170_v51 }
 0x29d   :  { %v908_v54 = vadd.f32 %v1172_v53, %v1137_v50 }
 0x29f   :  { %1303 = vmatmul.mubr.f32.vlgmr.msra.gmra.mrb[4].mxu1 %v908_v54 }
 0x372   :  { %v1000_v57 = vpop.f32.mrb[4].mxu1 }
 0x373   :  { %v1001_v58 = vadd.f32 %v1062_v55, %v1000_v57  ;;  %v1304_v60 = vpop.f32.mrb[5].mxu1 }
 0x375   :  { %1004 = vst [vmem:[#allocation10] sm:$0x3] %v1001_v58 }
 0x376   :  { %1546 = shalt.err (!%p1543_p8)
}
 0x377   :  { %s1547_s23 = scalar_lea.hbm %s1703_s5, 32 }
 0x378   :  { %p1548_p9 = scmp.ne.s32.totalorder %s1703_s5, %s1547_s23  ;;  %p1551_p10 = scmp.lt.u32.totalorder %s1547_s23, %s1703_s5 }
 0x37a   :  { %p1553_p11 = pnand %p1551_p10, %p1548_p9 }
 0x37c   :  { %1556 = shalt.err (!%p1553_p11)
}
 0x37d   :  { %1014 = dma.vmem_to_hbm [thread:$0]  %s1012_s18, 32, %s1703_s5, [#allocation4]  }
 0x37e   :  { %1563 = dma.done.wait [#allocation4], 32  }
 0x37f   :  { %1564 = vsyncadd [#allocation4], 4294967264 }
 0x380   :  { %1018 = vsyncpa [#allocation3], 1 }
 0x381   :  { %1019 = vsyncpa [#allocation6], 1 }
 0x382   :  { %1020 = vsyncpa [#allocation9], 1 }
 0x383   :  { %1021 = vsyncpa [#allocation4], 1 }

</bundles_post_ra>
